<compile_context>
chip_gen: v7x
topology: tpu7x:2x2x1
jax: 0.10.0
libtpu: 0.0.40
codegen_flags: <defaults>
</compile_context>

<pallas_src>
import jax
import jax.numpy as jnp
from jax.experimental import pallas as pl
from jax.experimental.pallas import tpu as pltpu


def _round_up(x, m):
    return ((x + m - 1) // m) * m


def _buffered_supported():
    try:
        pl.BlockSpec((8, 128), lambda i, k: (i, k), pipeline_mode=pl.Buffered(1))
        return True
    except Exception:
        return False


_HAS_BUFFERED = _buffered_supported()


def _spec(shape, index_map, *, single_buffer=False):
    if single_buffer and _HAS_BUFFERED:
        return pl.BlockSpec(shape, index_map, pipeline_mode=pl.Buffered(1))
    return pl.BlockSpec(shape, index_map)


def _tensorcores_per_device():
    # Best-effort detection of multi-TensorCore devices (v7x / megacore).
    try:
        d = jax.devices()[0]
        for attr in ("num_cores", "core_count"):
            v = getattr(d, attr, None)
            if isinstance(v, int) and v > 0:
                return v
    except Exception:
        pass
    try:
        info = pltpu.get_tpu_info()
        for attr in ("num_cores", "tensorcores_per_chip", "cores_per_chip"):
            v = getattr(info, attr, None)
            if isinstance(v, int) and v > 0:
                return v
    except Exception:
        pass
    return 1


def ff_kernel(x_ref, w1_ref, b1_ref, w2_ref, b2_ref, o_ref, acc_ref):
    # Grid: (row-tile i [parallel], d_ff chunk k [arbitrary, reduction]).
    # x_ref:  (TM, Dp)  compute dtype     w1_ref: (Dp, TK) compute dtype
    # b1_ref: (1, TK)   f32               w2_ref: (TK, Dp) compute dtype
    # b2_ref: (1, Dp)   f32               o_ref:  (TM, Dp) output dtype
    # acc_ref: (TM, Dp) f32 scratch, persists across the k axis.
    k = pl.program_id(1)

    @pl.when(k == 0)
    def _():
        # Fold the second-layer bias into the accumulator init (saves a
        # broadcast+add on the last-k critical path).
        acc_ref[...] = jnp.broadcast_to(b2_ref[...], acc_ref.shape)

    # First matmul for this d_ff chunk; bias-add + ReLU epilogue kept in f32.
    h = jnp.dot(x_ref[...], w1_ref[...], preferred_element_type=jnp.float32)
    h = jnp.maximum(h + b1_ref[...], 0.0)
    # Dropout(drop_p) -> identity in eval mode.
    h = h.astype(w2_ref.dtype)

    # Second matmul: partial contribution of this d_ff chunk to the output rows.
    acc_ref[...] += jnp.dot(h, w2_ref[...], preferred_element_type=jnp.float32)

    @pl.when(k == pl.num_programs(1) - 1)
    def _():
        o_ref[...] = acc_ref[...].astype(o_ref.dtype)


def _pad2d(a, rows, cols):
    r, c = a.shape
    if r == rows and c == cols:
        return a
    return jnp.pad(a, ((0, rows - r), (0, cols - c)))


def feed_forward(x, w1, b1, w2, b2, *, tile_m=512, tile_k=512,
                 compute_dtype=jnp.bfloat16):
    """x: (batch, seq, d_model) -> (batch, seq, d_model).

    w1: (d_model, d_ff), b1: (d_ff,), w2: (d_ff, d_model), b2: (d_model,).
    compute_dtype: MXU operand dtype for x/W1/W2 (default bf16; pass None to keep
    the input dtype). Accumulation and the bias/ReLU epilogue are always f32.
    """
    batch, seq, d_model = x.shape
    d_ff = w1.shape[1]
    M = batch * seq
    out_dtype = x.dtype
    op_dtype = jnp.dtype(compute_dtype) if compute_dtype is not None else jnp.dtype(x.dtype)
    op_sz = op_dtype.itemsize
    out_sz = jnp.dtype(out_dtype).itemsize

    # ---- tile sizing (lane/sublane aligned, clamped to the problem) ----
    d_model_p = _round_up(d_model, 128)                       # lane-dense outputs
    tile_m = max(8, min(_round_up(tile_m, 8), _round_up(M, 8)))
    tile_k = max(128, min(_round_up(tile_k, 128), _round_up(d_ff, 128)))
    tile_k_floor = 256 if _round_up(d_ff, 128) >= 256 else 128

    # Multi-TensorCore devices (v7x / megacore): ensure the "parallel" row axis has
    # at least one tile per core, otherwise a core sits idle on small-M shapes.
    cores = _tensorcores_per_device()
    if cores > 1 and _round_up(M, tile_m) // tile_m < cores:
        want = max(8, _round_up(pl.cdiv(M, cores), 8))
        tile_m = min(tile_m, want)

    # ---- per-generation VMEM budget; shrink tiles until the footprint fits ----
    try:
        vmem_cap = pltpu.get_tpu_info().vmem_capacity_bytes   # 64 MiB v7x, 128 MiB v5e/v6e
    except Exception:
        vmem_cap = 64 * 1024 * 1024
    budget = int(0.75 * vmem_cap)

    single_buf = _HAS_BUFFERED   # single-buffer the k-invariant blocks (x, b2, out)

    def footprint(tm, tk, single):
        rev = 1 if single else 2                  # buffering of k-invariant blocks
        return (rev * tm * d_model_p * op_sz      # x tile
                + rev * tm * d_model_p * out_sz   # out tile
                + rev * d_model_p * 4             # b2 (f32)
                + 2 * d_model_p * tk * op_sz      # W1 chunk (double-buffered)
                + 2 * tk * 4                      # b1 chunk (f32)
                + 2 * tk * d_model_p * op_sz      # W2 chunk (double-buffered)
                + tm * d_model_p * 4              # f32 accumulator scratch
                + tm * tk * (4 + op_sz))          # relu(x@W1) intermediate + cast copy

    # Shrink priority: tile_k (floor 256) -> tile_m (floor 256) -> tile_k (128)
    # -> tile_m (last resort). Weight HBM traffic scales with ceil(M/tile_m), so
    # protect tile_m; shrinking tile_k only adds cheap (~0.35us) extra grid steps.
    while footprint(tile_m, tile_k, single_buf) > budget:
        if tile_k > tile_k_floor:
            tile_k = max(tile_k_floor, _round_up(tile_k // 2, 128))
        elif tile_m > 256:
            tile_m = max(256, _round_up(tile_m // 2, 8))
        elif tile_k > 128:
            tile_k = 128
        elif tile_m > 8:
            tile_m = max(8, _round_up(tile_m // 2, 8))
        else:
            break

    M_p = _round_up(M, tile_m)
    d_ff_p = _round_up(d_ff, tile_k)

    # ---- cast + pad operands (zero padding contributes exactly zero) ----
    x2d = _pad2d(x.reshape(M, d_model).astype(op_dtype), M_p, d_model_p)
    w1p = _pad2d(w1.astype(op_dtype), d_model_p, d_ff_p)
    w2p = _pad2d(w2.astype(op_dtype), d_ff_p, d_model_p)
    b1p = _pad2d(b1.astype(jnp.float32).reshape(1, d_ff), 1, d_ff_p)
    b2p = _pad2d(b2.astype(jnp.float32).reshape(1, d_model), 1, d_model_p)

    grid = (M_p // tile_m, d_ff_p // tile_k)

    def run(single):
        fp = footprint(tile_m, tile_k, single)
        vmem_limit = int(min(max(32 << 20, int(1.25 * fp)), int(0.9 * vmem_cap)))
        in_specs = [
            _spec((tile_m, d_model_p), lambda i, k: (i, 0), single_buffer=single),  # x rows
            pl.BlockSpec((d_model_p, tile_k), lambda i, k: (0, k)),                 # W1 chunk
            pl.BlockSpec((1, tile_k), lambda i, k: (0, k)),                         # b1 chunk
            pl.BlockSpec((tile_k, d_model_p), lambda i, k: (k, 0)),                 # W2 chunk
            _spec((1, d_model_p), lambda i, k: (0, 0), single_buffer=single),       # b2
        ]
        out_spec = _spec((tile_m, d_model_p), lambda i, k: (i, 0), single_buffer=single)
        return pl.pallas_call(
            ff_kernel,
            out_shape=jax.ShapeDtypeStruct((M_p, d_model_p), out_dtype),
            grid_spec=pltpu.PrefetchScalarGridSpec(
                num_scalar_prefetch=0,
                grid=grid,
                in_specs=in_specs,
                out_specs=out_spec,
                scratch_shapes=[pltpu.VMEM((tile_m, d_model_p), jnp.float32)],
            ),
            compiler_params=pltpu.CompilerParams(
                dimension_semantics=("parallel", "arbitrary"),
                vmem_limit_bytes=vmem_limit,
            ),
        )(x2d, w1p, b1p, w2p, b2p)

    if single_buf:
        try:
            out2d = jax.block_until_ready(run(True))
        except Exception:
            # Fallback: plain double-buffered BlockSpecs (known-good configuration).
            out2d = run(False)
    else:
        out2d = run(False)

    return out2d[:M, :d_model].reshape(batch, seq, d_model)


if __name__ == "__main__":
    # Small demo shapes; deliberately unaligned to exercise padding / chunking paths:
    #   M = batch*seq = 20 (padded to tile_m), d_model = 96 (padded to 128),
    #   d_ff = 384 with tile_k=128 -> 3 reduction steps over the d_ff axis.
    batch, seq, d_model, d_ff = 2, 10, 96, 384
    drop_p = 0.1  # unused at inference (Dropout == identity in eval mode)

    key = jax.random.PRNGKey(0)
    kx, kw1, kb1, kw2, kb2 = jax.random.split(key, 5)

    x = jax.random.normal(kx, (batch, seq, d_model), dtype=jnp.float32)
    # Deterministic parameter init (shapes match nn.Linear(d_model, d_ff) etc.).
    w1 = jax.random.normal(kw1, (d_model, d_ff), dtype=jnp.float32) * 0.05
    b1 = jax.random.normal(kb1, (d_ff,), dtype=jnp.float32) * 0.05
    w2 = jax.random.normal(kw2, (d_ff, d_model), dtype=jnp.float32) * 0.05
    b2 = jax.random.normal(kb2, (d_model,), dtype=jnp.float32) * 0.05

    # Pure-JAX reference.
    ref = jnp.maximum(x @ w1 + b1, 0.0) @ w2 + b2

    # f32 operand path: tight numerical check.
    out_f32 = jax.block_until_ready(
        feed_forward(x, w1, b1, w2, b2, tile_m=512, tile_k=128, compute_dtype=None))
    assert out_f32.shape == (batch, seq, d_model)
    assert jnp.allclose(out_f32, ref, atol=1e-4, rtol=1e-4), \
        float(jnp.max(jnp.abs(out_f32 - ref)))

    # Default bf16 operand path (MXU-native, halves weight HBM traffic): looser tolerance.
    out_bf16 = jax.block_until_ready(feed_forward(x, w1, b1, w2, b2, tile_k=128))
    assert out_bf16.shape == (batch, seq, d_model)
    assert jnp.allclose(out_bf16, ref, atol=5e-2, rtol=5e-2), \
        float(jnp.max(jnp.abs(out_bf16 - ref)))

    print("KERNEL_OK")
</pallas_src>

<mosaic_0001>
module attributes {stable_mosaic.version = 11 : i64} {
  func.func @ff_kernel(%arg0: i32, %arg1: i32, %arg2: memref<24x128xf32, #tpu.memory_space<vmem>>, %arg3: memref<128x128xf32, #tpu.memory_space<vmem>>, %arg4: memref<1x128xf32, #tpu.memory_space<vmem>>, %arg5: memref<128x128xf32, #tpu.memory_space<vmem>>, %arg6: memref<1x128xf32, #tpu.memory_space<vmem>>, %arg7: memref<24x128xf32, #tpu.memory_space<vmem>>, %arg8: memref<24x128xf32, #tpu.memory_space<vmem>>) attributes {dimension_semantics = [#tpu.dimension_semantics<parallel>, #tpu.dimension_semantics<arbitrary>], iteration_bounds = array<i64: 1, 3>, scalar_prefetch = 0 : i64, scratch_operands = 1 : i64, tpu.core_type = #tpu.core_type<tc>, window_params = [{pipeline_mode = #tpu.pipeline_mode<synchronous>, transform_indices = @transform_0, window_bounds = array<i64: 24, 128>}, {transform_indices = @transform_1, window_bounds = array<i64: 128, 128>}, {transform_indices = @transform_2, window_bounds = array<i64: 1, 128>}, {transform_indices = @transform_3, window_bounds = array<i64: 128, 128>}, {pipeline_mode = #tpu.pipeline_mode<synchronous>, transform_indices = @transform_4, window_bounds = array<i64: 1, 128>}, {pipeline_mode = #tpu.pipeline_mode<synchronous>, transform_indices = @transform_5, window_bounds = array<i64: 24, 128>}]} {
    %c0_i32 = arith.constant 0 : i32
    %0 = arith.cmpi eq, %arg1, %c0_i32 : i32
    %1 = arith.extui %0 : i1 to i32
    %c0_i32_0 = arith.constant 0 : i32
    %2 = arith.cmpi ne, %1, %c0_i32_0 : i32
    scf.if %2 {
      %c0_15 = arith.constant 0 : index
      %c0_16 = arith.constant 0 : index
      %19 = vector.load %arg6[%c0_15, %c0_16] : memref<1x128xf32, #tpu.memory_space<vmem>>, vector<1x128xf32>
      %20 = vector.shape_cast %19 : vector<1x128xf32> to vector<1x128xf32>
      %21 = vector.broadcast %20 : vector<1x128xf32> to vector<24x128xf32>
      %c0_17 = arith.constant 0 : index
      %c0_18 = arith.constant 0 : index
      %22 = vector.load %arg8[%c0_17, %c0_18] : memref<24x128xf32, #tpu.memory_space<vmem>>, vector<24x128xf32>
      tpu.vector_store %arg8[%c0_17, %c0_18], %21 {strides = array<i32>} : memref<24x128xf32, #tpu.memory_space<vmem>>, vector<24x128xf32>,
    } else {
    }
    %c0 = arith.constant 0 : index
    %c0_1 = arith.constant 0 : index
    %3 = vector.load %arg2[%c0, %c0_1] : memref<24x128xf32, #tpu.memory_space<vmem>>, vector<24x128xf32>
    %c0_2 = arith.constant 0 : index
    %c0_3 = arith.constant 0 : index
    %4 = vector.load %arg3[%c0_2, %c0_3] : memref<128x128xf32, #tpu.memory_space<vmem>>, vector<128x128xf32>
    %cst = arith.constant dense<0.000000e+00> : vector<24x128xf32>
    %5 = tpu.matmul %3, %4, %cst {dimension_numbers = #tpu.dot_dimension_numbers<[1], [0], [0], [1], [0, 0, 1, 1], [], []>} : vector<24x128xf32>, vector<128x128xf32>, vector<24x128xf32> -> vector<24x128xf32>
    %c0_4 = arith.constant 0 : index
    %c0_5 = arith.constant 0 : index
    %6 = vector.load %arg4[%c0_4, %c0_5] : memref<1x128xf32, #tpu.memory_space<vmem>>, vector<1x128xf32>
    %7 = vector.broadcast %6 : vector<1x128xf32> to vector<24x128xf32>
    %8 = arith.addf %5, %7 : vector<24x128xf32>
    %cst_6 = arith.constant 0.000000e+00 : f32
    %9 = vector.broadcast %cst_6 : f32 to vector<24x128xf32>
    %10 = arith.maximumf %8, %9 : vector<24x128xf32>
    %c0_7 = arith.constant 0 : index
    %c0_8 = arith.constant 0 : index
    %11 = vector.load %arg8[%c0_7, %c0_8] : memref<24x128xf32, #tpu.memory_space<vmem>>, vector<24x128xf32>
    %c0_9 = arith.constant 0 : index
    %c0_10 = arith.constant 0 : index
    %12 = vector.load %arg5[%c0_9, %c0_10] : memref<128x128xf32, #tpu.memory_space<vmem>>, vector<128x128xf32>
    %cst_11 = arith.constant dense<0.000000e+00> : vector<24x128xf32>
    %13 = tpu.matmul %10, %12, %cst_11 {dimension_numbers = #tpu.dot_dimension_numbers<[1], [0], [0], [1], [0, 0, 1, 1], [], []>} : vector<24x128xf32>, vector<128x128xf32>, vector<24x128xf32> -> vector<24x128xf32>
    %14 = arith.addf %11, %13 : vector<24x128xf32>
    %c0_12 = arith.constant 0 : index
    %c0_13 = arith.constant 0 : index
    %15 = vector.load %arg8[%c0_12, %c0_13] : memref<24x128xf32, #tpu.memory_space<vmem>>, vector<24x128xf32>
    tpu.vector_store %arg8[%c0_12, %c0_13], %14 {strides = array<i32>} : memref<24x128xf32, #tpu.memory_space<vmem>>, vector<24x128xf32>,
    %c2_i32 = arith.constant 2 : i32
    %16 = arith.cmpi eq, %arg1, %c2_i32 : i32
    %17 = arith.extui %16 : i1 to i32
    %c0_i32_14 = arith.constant 0 : i32
    %18 = arith.cmpi ne, %17, %c0_i32_14 : i32
    scf.if %18 {
      %c0_15 = arith.constant 0 : index
      %c0_16 = arith.constant 0 : index
      %19 = vector.load %arg8[%c0_15, %c0_16] : memref<24x128xf32, #tpu.memory_space<vmem>>, vector<24x128xf32>
      %c0_17 = arith.constant 0 : index
      %c0_18 = arith.constant 0 : index
      %20 = vector.load %arg7[%c0_17, %c0_18] : memref<24x128xf32, #tpu.memory_space<vmem>>, vector<24x128xf32>
      tpu.vector_store %arg7[%c0_17, %c0_18], %19 {strides = array<i32>} : memref<24x128xf32, #tpu.memory_space<vmem>>, vector<24x128xf32>,
    } else {
    }
    return
  }
  func.func @transform_0(%arg0: i32, %arg1: i32) -> (i32, i32) {
    %c0_i32 = arith.constant 0 : i32
    %c0_i32_0 = arith.constant 0 : i32
    return %arg0, %c0_i32 : i32, i32
  }
  func.func @transform_1(%arg0: i32, %arg1: i32) -> (i32, i32) {
    %c0_i32 = arith.constant 0 : i32
    %c0_i32_0 = arith.constant 0 : i32
    return %c0_i32, %arg1 : i32, i32
  }
  func.func @transform_2(%arg0: i32, %arg1: i32) -> (i32, i32) {
    %c0_i32 = arith.constant 0 : i32
    %c0_i32_0 = arith.constant 0 : i32
    return %c0_i32, %arg1 : i32, i32
  }
  func.func @transform_3(%arg0: i32, %arg1: i32) -> (i32, i32) {
    %c0_i32 = arith.constant 0 : i32
    %c0_i32_0 = arith.constant 0 : i32
    return %arg1, %c0_i32 : i32, i32
  }
  func.func @transform_4(%arg0: i32, %arg1: i32) -> (i32, i32) {
    %c0_i32 = arith.constant 0 : i32
    %c0_i32_0 = arith.constant 0 : i32
    %c0_i32_1 = arith.constant 0 : i32
    return %c0_i32, %c0_i32_0 : i32, i32
  }
  func.func @transform_5(%arg0: i32, %arg1: i32) -> (i32, i32) {
    %c0_i32 = arith.constant 0 : i32
    %c0_i32_0 = arith.constant 0 : i32
    return %arg0, %c0_i32 : i32, i32
  }
}

module attributes {stable_mosaic.version = 11 : i64} {
  func.func @ff_kernel(%arg0: i32, %arg1: i32, %arg2: memref<24x128xf32, #tpu.memory_space<vmem>>, %arg3: memref<128x128xf32, #tpu.memory_space<vmem>>, %arg4: memref<1x128xf32, #tpu.memory_space<vmem>>, %arg5: memref<128x128xf32, #tpu.memory_space<vmem>>, %arg6: memref<1x128xf32, #tpu.memory_space<vmem>>, %arg7: memref<24x128xf32, #tpu.memory_space<vmem>>, %arg8: memref<24x128xf32, #tpu.memory_space<vmem>>) attributes {dimension_semantics = [#tpu.dimension_semantics<parallel>, #tpu.dimension_semantics<arbitrary>], iteration_bounds = array<i64: 1, 3>, scalar_prefetch = 0 : i64, scratch_operands = 1 : i64, tpu.core_type = #tpu.core_type<tc>, window_params = [{transform_indices = @transform_0, window_bounds = array<i64: 24, 128>}, {transform_indices = @transform_1, window_bounds = array<i64: 128, 128>}, {transform_indices = @transform_2, window_bounds = array<i64: 1, 128>}, {transform_indices = @transform_3, window_bounds = array<i64: 128, 128>}, {pipeline_mode = #tpu.pipeline_mode<synchronous>, transform_indices = @transform_4, window_bounds = array<i64: 1, 128>}, {transform_indices = @transform_5, window_bounds = array<i64: 24, 128>}]} {
    %c0_i32 = arith.constant 0 : i32
    %0 = arith.cmpi eq, %arg1, %c0_i32 : i32
    %1 = arith.extui %0 : i1 to i32
    %c0_i32_0 = arith.constant 0 : i32
    %2 = arith.cmpi ne, %1, %c0_i32_0 : i32
    scf.if %2 {
      %c0_15 = arith.constant 0 : index
      %c0_16 = arith.constant 0 : index
      %19 = vector.load %arg6[%c0_15, %c0_16] : memref<1x128xf32, #tpu.memory_space<vmem>>, vector<1x128xf32>
      %20 = vector.shape_cast %19 : vector<1x128xf32> to vector<1x128xf32>
      %21 = vector.broadcast %20 : vector<1x128xf32> to vector<24x128xf32>
      %c0_17 = arith.constant 0 : index
      %c0_18 = arith.constant 0 : index
      %22 = vector.load %arg8[%c0_17, %c0_18] : memref<24x128xf32, #tpu.memory_space<vmem>>, vector<24x128xf32>
      tpu.vector_store %arg8[%c0_17, %c0_18], %21 {strides = array<i32>} : memref<24x128xf32, #tpu.memory_space<vmem>>, vector<24x128xf32>,
    } else {
    }
    %c0 = arith.constant 0 : index
    %c0_1 = arith.constant 0 : index
    %3 = vector.load %arg2[%c0, %c0_1] : memref<24x128xf32, #tpu.memory_space<vmem>>, vector<24x128xf32>
    %c0_2 = arith.constant 0 : index
    %c0_3 = arith.constant 0 : index
    %4 = vector.load %arg3[%c0_2, %c0_3] : memref<128x128xf32, #tpu.memory_space<vmem>>, vector<128x128xf32>
    %cst = arith.constant dense<0.000000e+00> : vector<24x128xf32>
    %5 = tpu.matmul %3, %4, %cst {dimension_numbers = #tpu.dot_dimension_numbers<[1], [0], [0], [1], [0, 0, 1, 1], [], []>} : vector<24x128xf32>, vector<128x128xf32>, vector<24x128xf32> -> vector<24x128xf32>
    %c0_4 = arith.constant 0 : index
    %c0_5 = arith.constant 0 : index
    %6 = vector.load %arg4[%c0_4, %c0_5] : memref<1x128xf32, #tpu.memory_space<vmem>>, vector<1x128xf32>
    %7 = vector.broadcast %6 : vector<1x128xf32> to vector<24x128xf32>
    %8 = arith.addf %5, %7 : vector<24x128xf32>
    %cst_6 = arith.constant 0.000000e+00 : f32
    %9 = vector.broadcast %cst_6 : f32 to vector<24x128xf32>
    %10 = arith.maximumf %8, %9 : vector<24x128xf32>
    %c0_7 = arith.constant 0 : index
    %c0_8 = arith.constant 0 : index
    %11 = vector.load %arg8[%c0_7, %c0_8] : memref<24x128xf32, #tpu.memory_space<vmem>>, vector<24x128xf32>
    %c0_9 = arith.constant 0 : index
    %c0_10 = arith.constant 0 : index
    %12 = vector.load %arg5[%c0_9, %c0_10] : memref<128x128xf32, #tpu.memory_space<vmem>>, vector<128x128xf32>
    %cst_11 = arith.constant dense<0.000000e+00> : vector<24x128xf32>
    %13 = tpu.matmul %10, %12, %cst_11 {dimension_numbers = #tpu.dot_dimension_numbers<[1], [0], [0], [1], [0, 0, 1, 1], [], []>} : vector<24x128xf32>, vector<128x128xf32>, vector<24x128xf32> -> vector<24x128xf32>
    %14 = arith.addf %11, %13 : vector<24x128xf32>
    %c0_12 = arith.constant 0 : index
    %c0_13 = arith.constant 0 : index
    %15 = vector.load %arg8[%c0_12, %c0_13] : memref<24x128xf32, #tpu.memory_space<vmem>>, vector<24x128xf32>
    tpu.vector_store %arg8[%c0_12, %c0_13], %14 {strides = array<i32>} : memref<24x128xf32, #tpu.memory_space<vmem>>, vector<24x128xf32>,
    %c2_i32 = arith.constant 2 : i32
    %16 = arith.cmpi eq, %arg1, %c2_i32 : i32
    %17 = arith.extui %16 : i1 to i32
    %c0_i32_14 = arith.constant 0 : i32
    %18 = arith.cmpi ne, %17, %c0_i32_14 : i32
    scf.if %18 {
      %c0_15 = arith.constant 0 : index
      %c0_16 = arith.constant 0 : index
      %19 = vector.load %arg8[%c0_15, %c0_16] : memref<24x128xf32, #tpu.memory_space<vmem>>, vector<24x128xf32>
      %c0_17 = arith.constant 0 : index
      %c0_18 = arith.constant 0 : index
      %20 = vector.load %arg7[%c0_17, %c0_18] : memref<24x128xf32, #tpu.memory_space<vmem>>, vector<24x128xf32>
      tpu.vector_store %arg7[%c0_17, %c0_18], %19 {strides = array<i32>} : memref<24x128xf32, #tpu.memory_space<vmem>>, vector<24x128xf32>,
    } else {
    }
    return
  }
  func.func @transform_0(%arg0: i32, %arg1: i32) -> (i32, i32) {
    %c0_i32 = arith.constant 0 : i32
    %c0_i32_0 = arith.constant 0 : i32
    return %arg0, %c0_i32 : i32, i32
  }
  func.func @transform_1(%arg0: i32, %arg1: i32) -> (i32, i32) {
    %c0_i32 = arith.constant 0 : i32
    %c0_i32_0 = arith.constant 0 : i32
    return %c0_i32, %arg1 : i32, i32
  }
  func.func @transform_2(%arg0: i32, %arg1: i32) -> (i32, i32) {
    %c0_i32 = arith.constant 0 : i32
    %c0_i32_0 = arith.constant 0 : i32
    return %c0_i32, %arg1 : i32, i32
  }
  func.func @transform_3(%arg0: i32, %arg1: i32) -> (i32, i32) {
    %c0_i32 = arith.constant 0 : i32
    %c0_i32_0 = arith.constant 0 : i32
    return %arg1, %c0_i32 : i32, i32
  }
  func.func @transform_4(%arg0: i32, %arg1: i32) -> (i32, i32) {
    %c0_i32 = arith.constant 0 : i32
    %c0_i32_0 = arith.constant 0 : i32
    %c0_i32_1 = arith.constant 0 : i32
    return %c0_i32, %c0_i32_0 : i32, i32
  }
  func.func @transform_5(%arg0: i32, %arg1: i32) -> (i32, i32) {
    %c0_i32 = arith.constant 0 : i32
    %c0_i32_0 = arith.constant 0 : i32
    return %arg0, %c0_i32 : i32, i32
  }
}

</mosaic_0001>

<bundles_post_ra>
// kernel: tpu_custom_call.1
= control target key start
LH: loop header
LB: loop body
LE: loop exit
PB: predicated region body
PF: predicated region fallthrough
CT: control target
= control target key end

     0   :  { %10 = vsyncpa [#allocation4], 0  ;;  %s1489_s0 = inlined_call_operand.hbm [shape: f32[24,128], index: 0, kind: input, shape index: {}]   ;;  %s1490_s1 = inlined_call_operand.hbm [shape: f32[128,384], index: 1, kind: input, shape index: {}]   ;;  %s1491_s2 = inlined_call_operand.vmem [shape: f32[1,384], index: 2, kind: input, shape index: {}]   ;;  %s1492_s3 = inlined_call_operand.hbm [shape: f32[384,128], index: 3, kind: input, shape index: {}]   ;;  %s1493_s4 = inlined_call_operand.vmem [shape: f32[1,128], index: 4, kind: input, shape index: {}]   ;;  %s1494_s5 = inlined_call_operand.hbm [shape: f32[24,128], index: 5, kind: output, shape index: {}]  }
   0x1   :  { %11 = vsyncpa [#allocation7], 0 }
   0x2   :  { %13 = vsyncpa [#allocation7 + $0x1], 0 }
   0x3   :  { %14 = vsyncpa [#allocation5], 0  ;;  %s1170_s18 = smov 0   ;;  %s1172_s19 = smov 0  }
   0x4   :  { %s1174_s20 = smov 0   ;;  %s1176_s21 = smov 0  }
   0x5   :  { %s1178_s22 = smov 0   ;;  %s1180_s23 = smov 0  }
   0x6 LB: > { %s29_s24 = sadd.s32 1, %s1122_s22  ;;  %s65_s25 = sadd.s32 1, %s1114_s20  ;;  %s1126_s23 = sphi %s1180_s23, %s20_s23   ;;  %s1122_s22 = sphi %s1178_s22, %s1511_s22   ;;  %s1118_s21 = sphi %s1176_s21, %s1510_s21   ;;  %s1114_s20 = sphi %s1174_s20, %s1509_s20   ;;  %s1110_s19 = sphi %s1172_s19, %s1508_s19   ;;  %s1106_s18 = sphi %s1170_s18, %s1507_s18  }
   0x7   : > { %p30_p0 = scmp.ge.s32.totalorder %s29_s24, 3  ;;  %p72_p1 = scmp.ne.s32.totalorder %s1114_s20, %s1110_s19 }
   0x8   : > { %p73_p2 = scmp.eq.s32.totalorder %s1126_s23, 0  ;;  %p892_p5 = scmp.lt.s32.totalorder %s1126_s23, 3 }
   0x9   : > { %s1513_s24 = smov (%p30_p0, %s29_s24), 0  ;;  %s220_s28 = sand.u32 1, %s1126_s23  }
   0xa   : > { %p1207_p3 = por %p73_p2, %p72_p1  ;;  %s62_s27 = ssub.s32 %s1122_s22, %s1513_s24 }
   0xb   : > { %p63_p4 = scmp.eq.s32.totalorder %s62_s27, 0  ;;  %s222_s29 = sand.u32 1, %s1114_s20  }
   0xc   : > { %s1219_s6 = sshll.u32 %s222_s29, 7  ;;  %s683_s7 = sshll.u32 %s1122_s22, 7 }
   0xd   : > { %s1217_s30 = scalar_select %p63_p4, %s1114_s20, %s65_s25  }
   0xe   : > { %s1225_s10 = scalar_lea.hbm %s1490_s1, %s683_s7  ;;  %s224_s11 = scalar_lea.vmem [#allocation6], %s1219_s6 }
   0xf   : > { %s230_s12 = sshll.u32 %s224_s11, 4  ;;  %p1232_p6 = pnand %p892_p5, %p1207_p3  ;;  %s1228_s12 = int_to_ptr.vmem [resolvable:$true] %s230_s12 }
  0x10   : > { %s1236_s14 = scalar_lea.sflag [#allocation7], %s220_s28  ;;  %s954_s15 = scalar_lea.hbm %s1225_s10, 2048 }
  0x11   : > { %p955_p7 = scmp.ne.s32.totalorder %s1225_s10, %s954_s15  ;;  %p956_p8 = pneg %p1232_p6 }
  0x12   : > { %s959_s25 = scalar_lea.hbm %s1490_s1, 6144  ;;  %p960_p11 = scmp.lt.u32.totalorder %s1225_s10, %s1490_s1 }
  0x13   : > { %p957_p9 = pnand %p956_p8, %p955_p7  ;;  %p961_p12 = scmp.lt.u32.totalorder %s959_s25, %s954_s15 }
  0x14   : > { %p963_p0 = scmp.lt.u32.totalorder %s954_s15, %s1225_s10 }
  0x15   : > { %p958_p10 = pneg %p957_p9  ;;  %p962_p13 = por %p961_p12, %p960_p11 }
  0x17   : > { %p964_p1 = por %p963_p0, %p962_p13 }
  0x19   : > { %p965_p2 = pnand %p964_p1, %p958_p10 }
  0x1b   : > { %968 = shalt.err (!%p965_p2)
}
  0x1c   : > { %s969_s28 = scalar_lea.vmem %s1228_s12, 2048  ;;  %s1128_s29 = smov [#allocation6]  }
  0x1d   : > { %p970_p3 = scmp.ne.s32.totalorder %s1228_s12, %s969_s28  ;;  %s974_s7 = sshll.u32 %s1128_s29, 4  ;;  %s975_s7 = int_to_ptr.vmem [resolvable:$false] %s974_s7 }
  0x1e   : > { %s976_s8 = scalar_lea.vmem %s975_s7, 4096  ;;  %p977_p7 = scmp.lt.s32.totalorder %s1228_s12, %s975_s7 }
  0x1f   : > { %p972_p4 = pnand %p970_p3, %p956_p8  ;;  %p978_p9 = scmp.lt.s32.totalorder %s976_s8, %s969_s28 }
  0x21   : > { %p973_p5 = pneg %p972_p4  ;;  %p979_p11 = por %p978_p9, %p977_p7 }
  0x23   : > { %p980_p12 = pnand %p979_p11, %p973_p5 }
  0x25   : > { %983 = shalt.err (!%p980_p12)
}
  0x26   : > { %s1129_s9 = smov 384   ;;  %s1130_s11 = smov 128  }
  0x27   : > { %s1131_s15 = smov 8   ;;  %s1267_s16 = sadd.s32 4294967295, %s1126_s23  }
  0x28   : > { %887 = dma.hbm_to_vmem [thread:$0]  (!%p1232_p6), %s1225_s10, 2048, %s1228_s12, %s1236_s14, %s1129_s9, %s1130_s11, %s1131_s15  }
  0x29   : > { %p78_p10 = scmp.ne.s32.totalorder %s1110_s19, %s1106_s18  ;;  %p1495_p13 = scmp.eq.s32.totalorder %s1267_s16, 0 }
  0x2a   : > { %p679_p0 = scmp.ge.s32.totalorder %s1126_s23, 1  ;;  %p188_p1 = scmp.lt.s32.totalorder %s1126_s23, 4 }
  0x2b   : > { %p1276_p2 = por %p1495_p13, %p78_p10  ;;  %s1132_s10 = smov [#allocation3]  }
  0x2c   : > { %p1280_p3 = pnand %p679_p0, %p188_p1  ;;  %s203_s12 = sshll.u32 %s1132_s10, 4  ;;  %s1284_s12 = int_to_ptr.vmem [resolvable:$true] %s203_s12 }
  0x2d   : > { %s1500_s17 = scalar_select %p1276_p2, 1, 0 }
  0x2e   : > { %s1501_s25 = scalar_select %p1280_p3, 1, 0 }
  0x2f   : > { %p880_p4 = pneg %p1280_p3  ;;  %s699_s18 = sshll.u32 %s1122_s22, 11 }
  0x30   : > { %s1292_s28 = scalar_lea.hbm %s1492_s3, %s699_s18  ;;  %s250_s29 = scalar_lea.vmem [#allocation8], %s1219_s6 }
  0x31   : > { %s257_s7 = sshll.u32 %s250_s29, 4  ;;  %p1297_p5 = pnand %p880_p4, %p1495_p13  ;;  %s1301_s7 = int_to_ptr.vmem [resolvable:$true] %s257_s7 }
  0x32   : > { %s984_s9 = scalar_lea.hbm %s1292_s28, 2048  ;;  %s989_s26 = scalar_lea.hbm %s1492_s3, 6144 }
  0x33   : > { %p985_p7 = scmp.ne.s32.totalorder %s1292_s28, %s984_s9  ;;  %p990_p12 = scmp.lt.u32.totalorder %s1292_s28, %s1492_s3 }
  0x34   : > { %p991_p10 = scmp.lt.u32.totalorder %s989_s26, %s984_s9  ;;  %p993_p1 = scmp.lt.u32.totalorder %s984_s9, %s1292_s28 }
  0x35   : > { %p987_p9 = pnand %p985_p7, %p956_p8 }
  0x36   : > { %p992_p0 = por %p991_p10, %p990_p12 }
  0x37   : > { %p988_p11 = pneg %p987_p9 }
  0x38   : > { %p994_p4 = por %p993_p1, %p992_p0 }
  0x3a   : > { %p995_p13 = pnand %p994_p4, %p988_p11 }
  0x3c   : > { %998 = shalt.err (!%p995_p13)
}
  0x3d   : > { %s999_s29 = scalar_lea.vmem %s1301_s7, 2048  ;;  %s1133_s10 = smov [#allocation8]  }
  0x3e   : > { %p1000_p7 = scmp.ne.s32.totalorder %s1301_s7, %s999_s29  ;;  %s1004_s18 = sshll.u32 %s1133_s10, 4  ;;  %s1005_s18 = int_to_ptr.vmem [resolvable:$false] %s1004_s18 }
  0x3f   : > { %s1006_s27 = scalar_lea.vmem %s1005_s18, 4096  ;;  %p1007_p3 = scmp.lt.s32.totalorder %s1301_s7, %s1005_s18 }
  0x40   : > { %p1002_p9 = pnand %p1000_p7, %p956_p8  ;;  %p1008_p12 = scmp.lt.s32.totalorder %s1006_s27, %s999_s29 }
  0x42   : > { %p1003_p2 = pneg %p1002_p9  ;;  %p1009_p10 = por %p1008_p12, %p1007_p3 }
  0x44   : > { %p1010_p0 = pnand %p1009_p10, %p1003_p2 }
  0x46   : > { %1013 = shalt.err (!%p1010_p0)
}
  0x47   : > { %890 = dma.hbm_to_vmem [thread:$0]  (!%p1232_p6), %s1292_s28, 2048, %s1301_s7, %s1236_s14, %s1130_s11, %s1130_s11, %s1131_s15  }
  0x48   : > { %s1014_s6 = scalar_lea.hbm %s1489_s0, 384  ;;  %p1016_p13 = pneg %p1297_p5 }
  0x49   : > { %p1015_p8 = scmp.ne.s32.totalorder %s1489_s0, %s1014_s6  ;;  %p1021_p11 = scmp.lt.u32.totalorder %s1014_s6, %s1489_s0 }
  0x4b   : > { %p1017_p2 = pnand %p1016_p13, %p1015_p8 }
  0x4d   : > { %p1018_p3 = pneg %p1017_p2 }
  0x4f   : > { %p1023_p1 = pnand %p1021_p11, %p1018_p3 }
  0x51   : > { %1026 = shalt.err (!%p1023_p1)
}
  0x52   : > { %s1027_s14 = scalar_lea.vmem %s1284_s12, 384  ;;  %p1035_p9 = scmp.lt.s32.totalorder %s1284_s12, %s1284_s12 }
  0x53   : > { %p1028_p6 = scmp.ne.s32.totalorder %s1284_s12, %s1027_s14  ;;  %p1036_p12 = scmp.lt.s32.totalorder %s1027_s14, %s1027_s14 }
  0x55   : > { %p1030_p4 = pnand %p1028_p6, %p1016_p13  ;;  %p1037_p10 = por %p1036_p12, %p1035_p9 }
  0x57   : > { %p1031_p7 = pneg %p1030_p4 }
  0x59   : > { %p1038_p0 = pnand %p1037_p10, %p1031_p7 }
  0x5b   : > { %1041 = shalt.err (!%p1038_p0)
}
  0x5c   : > { %883 = dma.hbm_to_vmem [thread:$0]  (!%p1297_p5), %s1489_s0, 384, %s1284_s12, [#allocation4], %s1130_s11, %s1130_s11, %s1131_s15  }
  0x5d   : > { %p1503_p8 = scmp.ne.s32.totalorder %s1501_s25, 0 }
  0x5e   : > { %p1504_p13 = scmp.eq.s32.totalorder (!%p1503_p8), %s1267_s16, 0 }
  0x5f   : > { %269 = sbr.rel (%p1503_p8) target bundleno = 625 (0x271), region = 40 }
  0x66   : > { %1093 = dma.done.wait (%p1504_p13), [#allocation4], 384   ;;  %p1505_p2 = pmov %p1504_p13 }
  0x67   : > { %s275_s8 = sand.u32 1, %s1267_s16   ;;  %s277_s27 = sand.u32 1, %s1110_s19  }
  0x68   : > { %1095 = vsyncadd (%p1505_p2), [#allocation4], 4294966912  ;;  %s689_s9 = sshll.u32 %s277_s27, 7  ;;  %s276_s26 = scalar_lea.sflag [#allocation7], %s275_s8 }
  0x69   : > { %s1362_s6 = scalar_lea.vmem [#allocation6], %s689_s9  ;;  %p1506_p3 = scmp.ne.s32.totalorder %s1500_s17, 0 }
  0x6b   : > { %1097 = dma.done.wait (%p1506_p3), %s276_s26, 4096  }
  0x6c   : > { %1099 = vsyncadd (%p1506_p3), %s276_s26, 4294963200  ;;  %p319_p5 = scmp.lt.s32.totalorder %s1118_s21, 2  ;;  %s1376_s10 = scalar_lea.vmem [#allocation8], %s689_s9 }
  0x6d   : > { %p691_p11 = scmp.ne.s32.totalorder %s1118_s21, 0 }
  0x6e   : > { %s1370_s11 = scalar_select %p319_p5, %s1118_s21, 2 }
  0x6f   : > { %327 = sbr.rel (%p691_p11) target bundleno = 118 (0x76), region = 56  ;;  %v692_v0 = vld [vmem:[%s1493_s4] ss:$0 sm:$0xff] (!%p691_p11) }
  0x70   : > { %s321_s12 = scalar_lea.vmem %s1491_s2, %s1370_s11  ;;  %335 = vst [vmem:[#allocation2] sm:$0xff] (!%p691_p11), %v692_v0  ;;  %336 = vst [vmem:[#allocation2 + $0x8] sm:$0xff] (!%p691_p11), %v692_v0 }
  0x71   : > { %337 = vst [vmem:[#allocation2 + $0x10] sm:$0xff] (!%p691_p11), %v692_v0 }
  0x76 PF: > { %v341_v1 = vld [vmem:[%s1362_s6] sm:$0xff]  ;;  %v342_v2 = vld [vmem:[%s1362_s6 + $0x8] sm:$0xff]  ;;  %v343_v3 = vld [vmem:[%s1362_s6 + $0x10] sm:$0xff]  ;;  %v1134_v4 = vmov 0.0|0.0   ;;  %vm1135_vm0 = vmmov 0   ;;  %v1136_v7 = vmov 0.0  }
  0x77   : > { %820 = vmatprep.subr.bf16.mxu0 %v1134_v4  ;;  %v821_v5 = vpack.c.bf16 %v342_v2, %v341_v1  ;;  %v344_v6 = vld [vmem:[%s1362_s6 + $0x18] sm:$0xff]  ;;  %770 = vmatprep.mubr.msk.f32.mxu0 %vm1135_vm0, %v1136_v7  ;;  %v345_v9 = vld [vmem:[%s1362_s6 + $0x20] sm:$0xff]  ;;  %v346_v10 = vld [vmem:[%s1362_s6 + $0x28] sm:$0xff]  ;;  %p694_p1 = scmp.ne.s32.totalorder %s1118_s21, 2 }
  0x78   : > { %844 = vmatprep.subr.bf16.mxu1 %v1134_v4  ;;  %811 = vmatprep.mubr.msk.f32.mxu1 %vm1135_vm0, %v1136_v7  ;;  %v824_v8 = vpack.c.bf16 %v344_v6, %v343_v3  ;;  %v450_v11 = vld [vmem:[%s1376_s10] sm:$0xff]  ;;  %v451_v12 = vld [vmem:[%s1376_s10 + $0x8] sm:$0xff]  ;;  %v827_v13 = vpack.c.bf16 %v346_v10, %v345_v9  ;;  %v452_v15 = vld [vmem:[%s1376_s10 + $0x10] sm:$0xff] }
  0x79   : > { %822 = vmatpush3.bf16.msra.mxu0 %v821_v5  ;;  %v845_v14 = vpack.c.bf16 %v451_v12, %v450_v11  ;;  %v453_v16 = vld [vmem:[%s1376_s10 + $0x18] sm:$0xff]  ;;  %v347_v17 = vld [vmem:[%s1362_s6 + $0x30] sm:$0xff]  ;;  %v454_v20 = vld [vmem:[%s1376_s10 + $0x20] sm:$0xff] }
  0x7a   : > { %823 = vmatprep.subr.bf16.mxu0 %v1134_v4  ;;  %v348_v18 = vld [vmem:[%s1362_s6 + $0x38] sm:$0xff]  ;;  %v848_v19 = vpack.c.bf16 %v453_v16, %v452_v15  ;;  %v455_v21 = vld [vmem:[%s1376_s10 + $0x28] sm:$0xff]  ;;  %v349_v23 = vld [vmem:[%s1362_s6 + $0x40] sm:$0xff] }
  0x7b   : > { %846 = vmatpush3.bf16.msra.mxu1 %v845_v14  ;;  %v830_v22 = vpack.c.bf16 %v348_v18, %v347_v17  ;;  %v350_v24 = vld [vmem:[%s1362_s6 + $0x48] sm:$0xff]  ;;  %v851_v25 = vpack.c.bf16 %v455_v21, %v454_v20  ;;  %v456_v26 = vld [vmem:[%s1376_s10 + $0x30] sm:$0xff]  ;;  %v457_v27 = vld [vmem:[%s1376_s10 + $0x38] sm:$0xff] }
  0x7c   : > { %847 = vmatprep.subr.bf16.mxu1 %v1134_v4  ;;  %v833_v28 = vpack.c.bf16 %v350_v24, %v349_v23  ;;  %v351_v29 = vld [vmem:[%s1362_s6 + $0x50] sm:$0xff]  ;;  %v352_v30 = vld [vmem:[%s1362_s6 + $0x58] sm:$0xff]  ;;  %v854_v31 = vpack.c.bf16 %v457_v27, %v456_v26  ;;  %v458_v32 = vld [vmem:[%s1376_s10 + $0x40] sm:$0xff] }
  0x7d   : > { %825 = vmatpush3.bf16.msra.mxu0 %v824_v8  ;;  %v459_v33 = vld [vmem:[%s1376_s10 + $0x48] sm:$0xff]  ;;  %v836_v34 = vpack.c.bf16 %v352_v30, %v351_v29  ;;  %v353_v35 = vld [vmem:[%s1362_s6 + $0x60] sm:$0xff]  ;;  %v460_v38 = vld [vmem:[%s1376_s10 + $0x50] sm:$0xff] }
  0x7e   : > { %826 = vmatprep.subr.bf16.mxu0 %v1134_v4  ;;  %v354_v36 = vld [vmem:[%s1362_s6 + $0x68] sm:$0xff]  ;;  %v857_v37 = vpack.c.bf16 %v459_v33, %v458_v32  ;;  %v461_v39 = vld [vmem:[%s1376_s10 + $0x58] sm:$0xff]  ;;  %v355_v41 = vld [vmem:[%s1362_s6 + $0x70] sm:$0xff] }
  0x7f   : > { %849 = vmatpush3.bf16.msra.mxu1 %v848_v19  ;;  %v839_v40 = vpack.c.bf16 %v354_v36, %v353_v35  ;;  %v356_v42 = vld [vmem:[%s1362_s6 + $0x78] sm:$0xff]  ;;  %v860_v43 = vpack.c.bf16 %v461_v39, %v460_v38  ;;  %v462_v44 = vld [vmem:[%s1376_s10 + $0x60] sm:$0xff]  ;;  %v463_v45 = vld [vmem:[%s1376_s10 + $0x68] sm:$0xff] }
  0x80   : > { %850 = vmatprep.subr.bf16.mxu1 %v1134_v4  ;;  %v842_v46 = vpack.c.bf16 %v356_v42, %v355_v41  ;;  %v863_v47 = vpack.c.bf16 %v463_v45, %v462_v44  ;;  %v338_v48 = vld [vmem:[#allocation3] sm:$0xff]  ;;  %v339_v49 = vld [vmem:[#allocation3 + $0x8] sm:$0xff]  ;;  %v340_v50 = vld [vmem:[#allocation3 + $0x10] sm:$0xff] }
  0x81   : > { %828 = vmatpush3.bf16.msra.mxu0 %v827_v13  ;;  %v464_v51 = vld [vmem:[%s1376_s10 + $0x70] sm:$0xff]  ;;  %v465_v52 = vld [vmem:[%s1376_s10 + $0x78] sm:$0xff]  ;;  %v449_v12 = vld [vmem:[#allocation2 + $0x10] sm:$0xff] }
  0x82   : > { %829 = vmatprep.subr.bf16.mxu0 %v1134_v4  ;;  %v866_v53 = vpack.c.bf16 %v465_v52, %v464_v51  ;;  %v693_v54 = vld [vmem:[%s321_s12] ss:$0 sm:$0xff]  ;;  %v448_v8 = vld [vmem:[#allocation2 + $0x8] sm:$0xff] }
  0x83   : > { %852 = vmatpush3.bf16.msra.mxu1 %v851_v25  ;;  %v447_v3 = vld [vmem:[#allocation2] sm:$0xff] }
  0x84   : > { %853 = vmatprep.subr.bf16.mxu1 %v1134_v4 }
  0x85   : > { %831 = vmatpush3.bf16.msra.mxu0 %v830_v22 }
  0x86   : > { %832 = vmatprep.subr.bf16.mxu0 %v1134_v4 }
  0x87   : > { %855 = vmatpush3.bf16.msra.mxu1 %v854_v31 }
  0x88   : > { %856 = vmatprep.subr.bf16.mxu1 %v1134_v4 }
  0x89   : > { %834 = vmatpush3.bf16.msra.mxu0 %v833_v28 }
  0x8a   : > { %835 = vmatprep.subr.bf16.mxu0 %v1134_v4 }
  0x8b   : > { %858 = vmatpush3.bf16.msra.mxu1 %v857_v37 }
  0x8c   : > { %859 = vmatprep.subr.bf16.mxu1 %v1134_v4 }
  0x8d   : > { %837 = vmatpush3.bf16.msra.mxu0 %v836_v34 }
  0x8e   : > { %838 = vmatprep.subr.bf16.mxu0 %v1134_v4 }
  0x8f   : > { %861 = vmatpush3.bf16.msra.mxu1 %v860_v43 }
  0x90   : > { %862 = vmatprep.subr.bf16.mxu1 %v1134_v4 }
  0x91   : > { %840 = vmatpush3.bf16.msra.mxu0 %v839_v40 }
  0x92   : > { %841 = vmatprep.subr.bf16.mxu0 %v1134_v4 }
  0x93   : > { %864 = vmatpush3.bf16.msra.mxu1 %v863_v47 }
  0x94   : > { %865 = vmatprep.subr.bf16.mxu1 %v1134_v4 }
  0x95   : > { %843 = vmatpush3.bf16.msra.mxu0 %v842_v46 }
  0x97   : > { %867 = vmatpush3.bf16.msra.mxu1 %v866_v53 }
  0x98   : > { %771 = vmatmul.mubr.f32.vlgmr.msra.gmra.mrb[0].mxu0 %v338_v48 }
  0x99   : > { %773 = vmatprep.mubr.msk.f32.mxu0 %vm1135_vm0, %v1136_v7 }
  0x9c   : > { %774 = vmatmul.mubr.f32.gmra.mrb[2].mxu0 %v339_v49 }
  0x9d   : > { %776 = vmatprep.mubr.msk.f32.mxu0 %vm1135_vm0, %v1136_v7 }
  0xa0   : > { %777 = vmatmul.mubr.f32.gmra.mrb[4].mxu0 %v340_v50 }
 0x16b   : > { %v430_v55 = vpop.f32.mrb[0].mxu0 }
 0x16c   : > { %v431_v56 = vadd.f32 %v693_v54, %v430_v55  ;;  %v772_v57 = vpop.f32.mrb[1].mxu0 }
 0x16e   : > { %v444_v58 = vmax.f32 %v431_v56, 0.0 }
 0x16f   : > { %v435_v59 = vpop.f32.mrb[2].mxu0 }
 0x170   : > { %v436_v60 = vadd.f32 %v693_v54, %v435_v59  ;;  %v775_v61 = vpop.f32.mrb[3].mxu0  ;;  %812 = vmatmul.mubr.f32.vlgmr.msra.gmra.mrb[0].mxu1 %v444_v58 }
 0x171   : > { %814 = vmatprep.mubr.msk.f32.mxu1 %vm1135_vm0, %v1136_v7 }
 0x172   : > { %v445_v62 = vmax.f32 %v436_v60, 0.0 }
 0x173   : > { %v440_v63 = vpop.f32.mrb[4].mxu0 }
 0x174   : > { %v441_v0 = vadd.f32 %v693_v54, %v440_v63  ;;  %v778_v1 = vpop.f32.mrb[5].mxu0  ;;  %815 = vmatmul.mubr.f32.gmra.mrb[2].mxu1 %v445_v62 }
 0x175   : > { %817 = vmatprep.mubr.msk.f32.mxu1 %vm1135_vm0, %v1136_v7 }
 0x176   : > { %v446_v2 = vmax.f32 %v441_v0, 0.0 }
 0x178   : > { %818 = vmatmul.mubr.f32.gmra.mrb[4].mxu1 %v446_v2 }
 0x243   : > { %v532_v4 = vpop.f32.mrb[0].mxu1 }
 0x244   : > { %v546_v5 = vadd.f32 %v532_v4, %v447_v3  ;;  %v813_v6 = vpop.f32.mrb[1].mxu1 }
 0x246   : > { %549 = vst [vmem:[#allocation2] sm:$0xff] %v546_v5 }
 0x247   : > { %v537_v9 = vpop.f32.mrb[2].mxu1 }
 0x248   : > { %v547_v10 = vadd.f32 %v537_v9, %v448_v8  ;;  %v816_v11 = vpop.f32.mrb[3].mxu1  ;;  %555 = sbr.rel (%p694_p1) target bundleno = 599 (0x257), region = 60 }
 0x24a   : > { %550 = vst [vmem:[#allocation2 + $0x8] sm:$0xff] %v547_v10 }
 0x24b   : > { %v542_v13 = vpop.f32.mrb[4].mxu1 }
 0x24c   : > { %v548_v14 = vadd.f32 %v542_v13, %v449_v12  ;;  %v819_v15 = vpop.f32.mrb[5].mxu1 }
 0x24d   : > { %v556_v7 = vld [vmem:[#allocation2] sm:$0xff] (!%p694_p1) }
 0x24e   : > { %551 = vst [vmem:[#allocation2 + $0x10] sm:$0xff] %v548_v14  ;;  %559 = vst [vmem:[#allocation9] sm:$0xff] (!%p694_p1), %v556_v7 }
 0x251   : > { %v557_v16 = vld [vmem:[#allocation2 + $0x8] sm:$0xff] }
 0x252   : > { %560 = vst [vmem:[#allocation9 + $0x8] sm:$0xff] %v557_v16 }
 0x255   : > { %v558_v17 = vld [vmem:[#allocation2 + $0x10] sm:$0xff] }
 0x256   : > { %561 = vst [vmem:[#allocation9 + $0x10] sm:$0xff] %v558_v17 }
 0x257 PF: > { %p894_p6 = scmp.eq.s32.totalorder %s1267_s16, 2  ;;  %s1137_s14 = smov [#allocation9]  }
 0x258   : > { %s571_s28 = sshll.u32 %s1137_s14, 4  ;;  %s572_s28 = int_to_ptr.vmem [resolvable:$true] %s571_s28 }
 0x259   : > { %s1042_s7 = scalar_lea.vmem %s572_s28, 384  ;;  %p1049_p12 = scmp.lt.s32.totalorder %s572_s28, %s572_s28 }
 0x25a   : > { %p1043_p4 = scmp.ne.s32.totalorder %s572_s28, %s1042_s7  ;;  %p1050_p10 = scmp.lt.s32.totalorder %s1042_s7, %s1042_s7 }
 0x25c   : > { %p1044_p7 = pnand %p1043_p4, %p894_p6  ;;  %p1051_p0 = por %p1050_p10, %p1049_p12 }
 0x25e   : > { %p1045_p9 = pneg %p1044_p7 }
 0x260   : > { %p1052_p8 = pnand %p1051_p0, %p1045_p9 }
 0x262   : > { %1055 = shalt.err (!%p1052_p8)
}
 0x263   : > { %s1056_s27 = scalar_lea.hbm %s1494_s5, 384 }
 0x264   : > { %p1057_p13 = scmp.ne.s32.totalorder %s1494_s5, %s1056_s27  ;;  %p1062_p5 = scmp.lt.u32.totalorder %s1056_s27, %s1494_s5 }
 0x266   : > { %p1058_p2 = pnand %p1057_p13, %p894_p6 }
 0x268   : > { %p1059_p3 = pneg %p1058_p2 }
 0x26a   : > { %p1064_p11 = pnand %p1062_p5, %p1059_p3 }
 0x26c   : > { %1067 = shalt.err (!%p1064_p11)
}
 0x26d   : > { %s1138_s15 = smov 128   ;;  %s1139_s25 = smov 8  }
 0x26e   : > { %877 = dma.vmem_to_hbm [thread:$0]  (%p894_p6), %s572_s28, 384, %s1494_s5, [#allocation5], %s1138_s15, %s1138_s15, %s1139_s25  }
 0x26f   : > { %1101 = dma.done.wait (%p894_p6), [#allocation5], 384  }
 0x270   : > { %1103 = vsyncadd (%p894_p6), [#allocation5], 4294966912 }
 0x271 PF: > { %s20_s23 = sadd.s32 1, %s1126_s23   ;;  %s1507_s18 = smov %s1110_s19 }
 0x272   : > { %p17_p1 = scmp.ge.s32.totalorder %s20_s23, 5   ;;  %s1508_s19 = smov %s1114_s20 }
 0x273   : > { %s1509_s20 = smov %s1217_s30  ;;  %s1510_s21 = smov %s1122_s22 }
 0x274   : > { %s1511_s22 = smov %s1513_s24  ;;  %19 = sbr.rel (!%p17_p1) target bundleno = 6 (0x6), region = 106 }
 0x27b   :  { %587 = vsyncpa [#allocation4], 1 }
 0x27c   :  { %589 = vsyncpa [#allocation4 + $0x1], 1 }
 0x27d   :  { %590 = vsyncpa [#allocation7], 1 }
 0x27e   :  { %592 = vsyncpa [#allocation7 + $0x1], 1 }
 0x27f   :  { %593 = vsyncpa [#allocation5], 1 }
 0x280   :  { %595 = vsyncpa [#allocation5 + $0x1], 1 }

// kernel: tpu_custom_call.1
= control target key start
LH: loop header
LB: loop body
LE: loop exit
PB: predicated region body
PF: predicated region fallthrough
CT: control target
= control target key end

     0   :  { %10 = vsyncpa [#allocation4], 0  ;;  %s1489_s0 = inlined_call_operand.hbm [shape: f32[24,128], index: 0, kind: input, shape index: {}]   ;;  %s1490_s1 = inlined_call_operand.hbm [shape: f32[128,384], index: 1, kind: input, shape index: {}]   ;;  %s1491_s2 = inlined_call_operand.vmem [shape: f32[1,384], index: 2, kind: input, shape index: {}]   ;;  %s1492_s3 = inlined_call_operand.hbm [shape: f32[384,128], index: 3, kind: input, shape index: {}]   ;;  %s1493_s4 = inlined_call_operand.vmem [shape: f32[1,128], index: 4, kind: input, shape index: {}]   ;;  %s1494_s5 = inlined_call_operand.hbm [shape: f32[24,128], index: 5, kind: output, shape index: {}]  }
   0x1   :  { %11 = vsyncpa [#allocation7], 0 }
   0x2   :  { %13 = vsyncpa [#allocation7 + $0x1], 0 }
   0x3   :  { %14 = vsyncpa [#allocation5], 0  ;;  %s1170_s18 = smov 0   ;;  %s1172_s19 = smov 0  }
   0x4   :  { %s1174_s20 = smov 0   ;;  %s1176_s21 = smov 0  }
   0x5   :  { %s1178_s22 = smov 0   ;;  %s1180_s23 = smov 0  }
   0x6 LB: > { %s29_s24 = sadd.s32 1, %s1122_s22  ;;  %s65_s25 = sadd.s32 1, %s1114_s20  ;;  %s1126_s23 = sphi %s1180_s23, %s20_s23   ;;  %s1122_s22 = sphi %s1178_s22, %s1511_s22   ;;  %s1118_s21 = sphi %s1176_s21, %s1510_s21   ;;  %s1114_s20 = sphi %s1174_s20, %s1509_s20   ;;  %s1110_s19 = sphi %s1172_s19, %s1508_s19   ;;  %s1106_s18 = sphi %s1170_s18, %s1507_s18  }
   0x7   : > { %p30_p0 = scmp.ge.s32.totalorder %s29_s24, 3  ;;  %p72_p1 = scmp.ne.s32.totalorder %s1114_s20, %s1110_s19 }
   0x8   : > { %p73_p2 = scmp.eq.s32.totalorder %s1126_s23, 0  ;;  %p892_p5 = scmp.lt.s32.totalorder %s1126_s23, 3 }
   0x9   : > { %s1513_s24 = smov (%p30_p0, %s29_s24), 0  ;;  %s220_s28 = sand.u32 1, %s1126_s23  }
   0xa   : > { %p1207_p3 = por %p73_p2, %p72_p1  ;;  %s62_s27 = ssub.s32 %s1122_s22, %s1513_s24 }
   0xb   : > { %p63_p4 = scmp.eq.s32.totalorder %s62_s27, 0  ;;  %s222_s29 = sand.u32 1, %s1114_s20  }
   0xc   : > { %s1219_s6 = sshll.u32 %s222_s29, 7  ;;  %s683_s7 = sshll.u32 %s1122_s22, 7 }
   0xd   : > { %s1217_s30 = scalar_select %p63_p4, %s1114_s20, %s65_s25  }
   0xe   : > { %s1225_s10 = scalar_lea.hbm %s1490_s1, %s683_s7  ;;  %s224_s11 = scalar_lea.vmem [#allocation6], %s1219_s6 }
   0xf   : > { %s230_s12 = sshll.u32 %s224_s11, 4  ;;  %p1232_p6 = pnand %p892_p5, %p1207_p3  ;;  %s1228_s12 = int_to_ptr.vmem [resolvable:$true] %s230_s12 }
  0x10   : > { %s1236_s14 = scalar_lea.sflag [#allocation7], %s220_s28  ;;  %s954_s15 = scalar_lea.hbm %s1225_s10, 2048 }
  0x11   : > { %p955_p7 = scmp.ne.s32.totalorder %s1225_s10, %s954_s15  ;;  %p956_p8 = pneg %p1232_p6 }
  0x12   : > { %s959_s25 = scalar_lea.hbm %s1490_s1, 6144  ;;  %p960_p11 = scmp.lt.u32.totalorder %s1225_s10, %s1490_s1 }
  0x13   : > { %p957_p9 = pnand %p956_p8, %p955_p7  ;;  %p961_p12 = scmp.lt.u32.totalorder %s959_s25, %s954_s15 }
  0x14   : > { %p963_p0 = scmp.lt.u32.totalorder %s954_s15, %s1225_s10 }
  0x15   : > { %p958_p10 = pneg %p957_p9  ;;  %p962_p13 = por %p961_p12, %p960_p11 }
  0x17   : > { %p964_p1 = por %p963_p0, %p962_p13 }
  0x19   : > { %p965_p2 = pnand %p964_p1, %p958_p10 }
  0x1b   : > { %968 = shalt.err (!%p965_p2)
}
  0x1c   : > { %s969_s28 = scalar_lea.vmem %s1228_s12, 2048  ;;  %s1128_s29 = smov [#allocation6]  }
  0x1d   : > { %p970_p3 = scmp.ne.s32.totalorder %s1228_s12, %s969_s28  ;;  %s974_s7 = sshll.u32 %s1128_s29, 4  ;;  %s975_s7 = int_to_ptr.vmem [resolvable:$false] %s974_s7 }
  0x1e   : > { %s976_s8 = scalar_lea.vmem %s975_s7, 4096  ;;  %p977_p7 = scmp.lt.s32.totalorder %s1228_s12, %s975_s7 }
  0x1f   : > { %p972_p4 = pnand %p970_p3, %p956_p8  ;;  %p978_p9 = scmp.lt.s32.totalorder %s976_s8, %s969_s28 }
  0x21   : > { %p973_p5 = pneg %p972_p4  ;;  %p979_p11 = por %p978_p9, %p977_p7 }
  0x23   : > { %p980_p12 = pnand %p979_p11, %p973_p5 }
  0x25   : > { %983 = shalt.err (!%p980_p12)
}
  0x26   : > { %s1129_s9 = smov 384   ;;  %s1130_s11 = smov 128  }
  0x27   : > { %s1131_s15 = smov 8   ;;  %s1267_s16 = sadd.s32 4294967295, %s1126_s23  }
  0x28   : > { %887 = dma.hbm_to_vmem [thread:$0]  (!%p1232_p6), %s1225_s10, 2048, %s1228_s12, %s1236_s14, %s1129_s9, %s1130_s11, %s1131_s15  }
  0x29   : > { %p78_p10 = scmp.ne.s32.totalorder %s1110_s19, %s1106_s18  ;;  %p1495_p13 = scmp.eq.s32.totalorder %s1267_s16, 0 }
  0x2a   : > { %p679_p0 = scmp.ge.s32.totalorder %s1126_s23, 1  ;;  %p188_p1 = scmp.lt.s32.totalorder %s1126_s23, 4 }
  0x2b   : > { %p1276_p2 = por %p1495_p13, %p78_p10  ;;  %s1132_s10 = smov [#allocation3]  }
  0x2c   : > { %p1280_p3 = pnand %p679_p0, %p188_p1  ;;  %s203_s12 = sshll.u32 %s1132_s10, 4  ;;  %s1284_s12 = int_to_ptr.vmem [resolvable:$true] %s203_s12 }
  0x2d   : > { %s1500_s17 = scalar_select %p1276_p2, 1, 0 }
  0x2e   : > { %s1501_s25 = scalar_select %p1280_p3, 1, 0 }
  0x2f   : > { %p880_p4 = pneg %p1280_p3  ;;  %s699_s18 = sshll.u32 %s1122_s22, 11 }
  0x30   : > { %s1292_s28 = scalar_lea.hbm %s1492_s3, %s699_s18  ;;  %s250_s29 = scalar_lea.vmem [#allocation8], %s1219_s6 }
  0x31   : > { %s257_s7 = sshll.u32 %s250_s29, 4  ;;  %p1297_p5 = pnand %p880_p4, %p1495_p13  ;;  %s1301_s7 = int_to_ptr.vmem [resolvable:$true] %s257_s7 }
  0x32   : > { %s984_s9 = scalar_lea.hbm %s1292_s28, 2048  ;;  %s989_s26 = scalar_lea.hbm %s1492_s3, 6144 }
  0x33   : > { %p985_p7 = scmp.ne.s32.totalorder %s1292_s28, %s984_s9  ;;  %p990_p12 = scmp.lt.u32.totalorder %s1292_s28, %s1492_s3 }
  0x34   : > { %p991_p10 = scmp.lt.u32.totalorder %s989_s26, %s984_s9  ;;  %p993_p1 = scmp.lt.u32.totalorder %s984_s9, %s1292_s28 }
  0x35   : > { %p987_p9 = pnand %p985_p7, %p956_p8 }
  0x36   : > { %p992_p0 = por %p991_p10, %p990_p12 }
  0x37   : > { %p988_p11 = pneg %p987_p9 }
  0x38   : > { %p994_p4 = por %p993_p1, %p992_p0 }
  0x3a   : > { %p995_p13 = pnand %p994_p4, %p988_p11 }
  0x3c   : > { %998 = shalt.err (!%p995_p13)
}
  0x3d   : > { %s999_s29 = scalar_lea.vmem %s1301_s7, 2048  ;;  %s1133_s10 = smov [#allocation8]  }
  0x3e   : > { %p1000_p7 = scmp.ne.s32.totalorder %s1301_s7, %s999_s29  ;;  %s1004_s18 = sshll.u32 %s1133_s10, 4  ;;  %s1005_s18 = int_to_ptr.vmem [resolvable:$false] %s1004_s18 }
  0x3f   : > { %s1006_s27 = scalar_lea.vmem %s1005_s18, 4096  ;;  %p1007_p3 = scmp.lt.s32.totalorder %s1301_s7, %s1005_s18 }
  0x40   : > { %p1002_p9 = pnand %p1000_p7, %p956_p8  ;;  %p1008_p12 = scmp.lt.s32.totalorder %s1006_s27, %s999_s29 }
  0x42   : > { %p1003_p2 = pneg %p1002_p9  ;;  %p1009_p10 = por %p1008_p12, %p1007_p3 }
  0x44   : > { %p1010_p0 = pnand %p1009_p10, %p1003_p2 }
  0x46   : > { %1013 = shalt.err (!%p1010_p0)
}
  0x47   : > { %890 = dma.hbm_to_vmem [thread:$0]  (!%p1232_p6), %s1292_s28, 2048, %s1301_s7, %s1236_s14, %s1130_s11, %s1130_s11, %s1131_s15  }
  0x48   : > { %s1014_s6 = scalar_lea.hbm %s1489_s0, 384  ;;  %p1016_p13 = pneg %p1297_p5 }
  0x49   : > { %p1015_p8 = scmp.ne.s32.totalorder %s1489_s0, %s1014_s6  ;;  %p1021_p11 = scmp.lt.u32.totalorder %s1014_s6, %s1489_s0 }
  0x4b   : > { %p1017_p2 = pnand %p1016_p13, %p1015_p8 }
  0x4d   : > { %p1018_p3 = pneg %p1017_p2 }
  0x4f   : > { %p1023_p1 = pnand %p1021_p11, %p1018_p3 }
  0x51   : > { %1026 = shalt.err (!%p1023_p1)
}
  0x52   : > { %s1027_s14 = scalar_lea.vmem %s1284_s12, 384  ;;  %p1035_p9 = scmp.lt.s32.totalorder %s1284_s12, %s1284_s12 }
  0x53   : > { %p1028_p6 = scmp.ne.s32.totalorder %s1284_s12, %s1027_s14  ;;  %p1036_p12 = scmp.lt.s32.totalorder %s1027_s14, %s1027_s14 }
  0x55   : > { %p1030_p4 = pnand %p1028_p6, %p1016_p13  ;;  %p1037_p10 = por %p1036_p12, %p1035_p9 }
  0x57   : > { %p1031_p7 = pneg %p1030_p4 }
  0x59   : > { %p1038_p0 = pnand %p1037_p10, %p1031_p7 }
  0x5b   : > { %1041 = shalt.err (!%p1038_p0)
}
  0x5c   : > { %883 = dma.hbm_to_vmem [thread:$0]  (!%p1297_p5), %s1489_s0, 384, %s1284_s12, [#allocation4], %s1130_s11, %s1130_s11, %s1131_s15  }
  0x5d   : > { %p1503_p8 = scmp.ne.s32.totalorder %s1501_s25, 0 }
  0x5e   : > { %p1504_p13 = scmp.eq.s32.totalorder (!%p1503_p8), %s1267_s16, 0 }
  0x5f   : > { %269 = sbr.rel (%p1503_p8) target bundleno = 625 (0x271), region = 40 }
  0x66   : > { %1093 = dma.done.wait (%p1504_p13), [#allocation4], 384   ;;  %p1505_p2 = pmov %p1504_p13 }
  0x67   : > { %s275_s8 = sand.u32 1, %s1267_s16   ;;  %s277_s27 = sand.u32 1, %s1110_s19  }
  0x68   : > { %1095 = vsyncadd (%p1505_p2), [#allocation4], 4294966912  ;;  %s689_s9 = sshll.u32 %s277_s27, 7  ;;  %s276_s26 = scalar_lea.sflag [#allocation7], %s275_s8 }
  0x69   : > { %s1362_s6 = scalar_lea.vmem [#allocation6], %s689_s9  ;;  %p1506_p3 = scmp.ne.s32.totalorder %s1500_s17, 0 }
  0x6b   : > { %1097 = dma.done.wait (%p1506_p3), %s276_s26, 4096  }
  0x6c   : > { %1099 = vsyncadd (%p1506_p3), %s276_s26, 4294963200  ;;  %p319_p5 = scmp.lt.s32.totalorder %s1118_s21, 2  ;;  %s1376_s10 = scalar_lea.vmem [#allocation8], %s689_s9 }
  0x6d   : > { %p691_p11 = scmp.ne.s32.totalorder %s1118_s21, 0 }
  0x6e   : > { %s1370_s11 = scalar_select %p319_p5, %s1118_s21, 2 }
  0x6f   : > { %327 = sbr.rel (%p691_p11) target bundleno = 118 (0x76), region = 56  ;;  %v692_v0 = vld [vmem:[%s1493_s4] ss:$0 sm:$0xff] (!%p691_p11) }
  0x70   : > { %s321_s12 = scalar_lea.vmem %s1491_s2, %s1370_s11  ;;  %335 = vst [vmem:[#allocation2] sm:$0xff] (!%p691_p11), %v692_v0  ;;  %336 = vst [vmem:[#allocation2 + $0x8] sm:$0xff] (!%p691_p11), %v692_v0 }
  0x71   : > { %337 = vst [vmem:[#allocation2 + $0x10] sm:$0xff] (!%p691_p11), %v692_v0 }
  0x76 PF: > { %v341_v1 = vld [vmem:[%s1362_s6] sm:$0xff]  ;;  %v342_v2 = vld [vmem:[%s1362_s6 + $0x8] sm:$0xff]  ;;  %v343_v3 = vld [vmem:[%s1362_s6 + $0x10] sm:$0xff]  ;;  %v1134_v4 = vmov 0.0|0.0   ;;  %vm1135_vm0 = vmmov 0   ;;  %v1136_v7 = vmov 0.0  }
  0x77   : > { %820 = vmatprep.subr.bf16.mxu0 %v1134_v4  ;;  %v821_v5 = vpack.c.bf16 %v342_v2, %v341_v1  ;;  %v344_v6 = vld [vmem:[%s1362_s6 + $0x18] sm:$0xff]  ;;  %770 = vmatprep.mubr.msk.f32.mxu0 %vm1135_vm0, %v1136_v7  ;;  %v345_v9 = vld [vmem:[%s1362_s6 + $0x20] sm:$0xff]  ;;  %v346_v10 = vld [vmem:[%s1362_s6 + $0x28] sm:$0xff]  ;;  %p694_p1 = scmp.ne.s32.totalorder %s1118_s21, 2 }
  0x78   : > { %844 = vmatprep.subr.bf16.mxu1 %v1134_v4  ;;  %811 = vmatprep.mubr.msk.f32.mxu1 %vm1135_vm0, %v1136_v7  ;;  %v824_v8 = vpack.c.bf16 %v344_v6, %v343_v3  ;;  %v450_v11 = vld [vmem:[%s1376_s10] sm:$0xff]  ;;  %v451_v12 = vld [vmem:[%s1376_s10 + $0x8] sm:$0xff]  ;;  %v827_v13 = vpack.c.bf16 %v346_v10, %v345_v9  ;;  %v452_v15 = vld [vmem:[%s1376_s10 + $0x10] sm:$0xff] }
  0x79   : > { %822 = vmatpush3.bf16.msra.mxu0 %v821_v5  ;;  %v845_v14 = vpack.c.bf16 %v451_v12, %v450_v11  ;;  %v453_v16 = vld [vmem:[%s1376_s10 + $0x18] sm:$0xff]  ;;  %v347_v17 = vld [vmem:[%s1362_s6 + $0x30] sm:$0xff]  ;;  %v454_v20 = vld [vmem:[%s1376_s10 + $0x20] sm:$0xff] }
  0x7a   : > { %823 = vmatprep.subr.bf16.mxu0 %v1134_v4  ;;  %v348_v18 = vld [vmem:[%s1362_s6 + $0x38] sm:$0xff]  ;;  %v848_v19 = vpack.c.bf16 %v453_v16, %v452_v15  ;;  %v455_v21 = vld [vmem:[%s1376_s10 + $0x28] sm:$0xff]  ;;  %v349_v23 = vld [vmem:[%s1362_s6 + $0x40] sm:$0xff] }
  0x7b   : > { %846 = vmatpush3.bf16.msra.mxu1 %v845_v14  ;;  %v830_v22 = vpack.c.bf16 %v348_v18, %v347_v17  ;;  %v350_v24 = vld [vmem:[%s1362_s6 + $0x48] sm:$0xff]  ;;  %v851_v25 = vpack.c.bf16 %v455_v21, %v454_v20  ;;  %v456_v26 = vld [vmem:[%s1376_s10 + $0x30] sm:$0xff]  ;;  %v457_v27 = vld [vmem:[%s1376_s10 + $0x38] sm:$0xff] }
  0x7c   : > { %847 = vmatprep.subr.bf16.mxu1 %v1134_v4  ;;  %v833_v28 = vpack.c.bf16 %v350_v24, %v349_v23  ;;  %v351_v29 = vld [vmem:[%s1362_s6 + $0x50] sm:$0xff]  ;;  %v352_v30 = vld [vmem:[%s1362_s6 + $0x58] sm:$0xff]  ;;  %v854_v31 = vpack.c.bf16 %v457_v27, %v456_v26  ;;  %v458_v32 = vld [vmem:[%s1376_s10 + $0x40] sm:$0xff] }
  0x7d   : > { %825 = vmatpush3.bf16.msra.mxu0 %v824_v8  ;;  %v459_v33 = vld [vmem:[%s1376_s10 + $0x48] sm:$0xff]  ;;  %v836_v34 = vpack.c.bf16 %v352_v30, %v351_v29  ;;  %v353_v35 = vld [vmem:[%s1362_s6 + $0x60] sm:$0xff]  ;;  %v460_v38 = vld [vmem:[%s1376_s10 + $0x50] sm:$0xff] }
  0x7e   : > { %826 = vmatprep.subr.bf16.mxu0 %v1134_v4  ;;  %v354_v36 = vld [vmem:[%s1362_s6 + $0x68] sm:$0xff]  ;;  %v857_v37 = vpack.c.bf16 %v459_v33, %v458_v32  ;;  %v461_v39 = vld [vmem:[%s1376_s10 + $0x58] sm:$0xff]  ;;  %v355_v41 = vld [vmem:[%s1362_s6 + $0x70] sm:$0xff] }
  0x7f   : > { %849 = vmatpush3.bf16.msra.mxu1 %v848_v19  ;;  %v839_v40 = vpack.c.bf16 %v354_v36, %v353_v35  ;;  %v356_v42 = vld [vmem:[%s1362_s6 + $0x78] sm:$0xff]  ;;  %v860_v43 = vpack.c.bf16 %v461_v39, %v460_v38  ;;  %v462_v44 = vld [vmem:[%s1376_s10 + $0x60] sm:$0xff]  ;;  %v463_v45 = vld [vmem:[%s1376_s10 + $0x68] sm:$0xff] }
  0x80   : > { %850 = vmatprep.subr.bf16.mxu1 %v1134_v4  ;;  %v842_v46 = vpack.c.bf16 %v356_v42, %v355_v41  ;;  %v863_v47 = vpack.c.bf16 %v463_v45, %v462_v44  ;;  %v338_v48 = vld [vmem:[#allocation3] sm:$0xff]  ;;  %v339_v49 = vld [vmem:[#allocation3 + $0x8] sm:$0xff]  ;;  %v340_v50 = vld [vmem:[#allocation3 + $0x10] sm:$0xff] }
  0x81   : > { %828 = vmatpush3.bf16.msra.mxu0 %v827_v13  ;;  %v464_v51 = vld [vmem:[%s1376_s10 + $0x70] sm:$0xff]  ;;  %v465_v52 = vld [vmem:[%s1376_s10 + $0x78] sm:$0xff]  ;;  %v449_v12 = vld [vmem:[#allocation2 + $0x10] sm:$0xff] }
  0x82   : > { %829 = vmatprep.subr.bf16.mxu0 %v1134_v4  ;;  %v866_v53 = vpack.c.bf16 %v465_v52, %v464_v51  ;;  %v693_v54 = vld [vmem:[%s321_s12] ss:$0 sm:$0xff]  ;;  %v448_v8 = vld [vmem:[#allocation2 + $0x8] sm:$0xff] }
  0x83   : > { %852 = vmatpush3.bf16.msra.mxu1 %v851_v25  ;;  %v447_v3 = vld [vmem:[#allocation2] sm:$0xff] }
  0x84   : > { %853 = vmatprep.subr.bf16.mxu1 %v1134_v4 }
  0x85   : > { %831 = vmatpush3.bf16.msra.mxu0 %v830_v22 }
  0x86   : > { %832 = vmatprep.subr.bf16.mxu0 %v1134_v4 }
  0x87   : > { %855 = vmatpush3.bf16.msra.mxu1 %v854_v31 }
  0x88   : > { %856 = vmatprep.subr.bf16.mxu1 %v1134_v4 }
  0x89   : > { %834 = vmatpush3.bf16.msra.mxu0 %v833_v28 }
  0x8a   : > { %835 = vmatprep.subr.bf16.mxu0 %v1134_v4 }
  0x8b   : > { %858 = vmatpush3.bf16.msra.mxu1 %v857_v37 }
  0x8c   : > { %859 = vmatprep.subr.bf16.mxu1 %v1134_v4 }
  0x8d   : > { %837 = vmatpush3.bf16.msra.mxu0 %v836_v34 }
  0x8e   : > { %838 = vmatprep.subr.bf16.mxu0 %v1134_v4 }
  0x8f   : > { %861 = vmatpush3.bf16.msra.mxu1 %v860_v43 }
  0x90   : > { %862 = vmatprep.subr.bf16.mxu1 %v1134_v4 }
  0x91   : > { %840 = vmatpush3.bf16.msra.mxu0 %v839_v40 }
  0x92   : > { %841 = vmatprep.subr.bf16.mxu0 %v1134_v4 }
  0x93   : > { %864 = vmatpush3.bf16.msra.mxu1 %v863_v47 }
  0x94   : > { %865 = vmatprep.subr.bf16.mxu1 %v1134_v4 }
  0x95   : > { %843 = vmatpush3.bf16.msra.mxu0 %v842_v46 }
  0x97   : > { %867 = vmatpush3.bf16.msra.mxu1 %v866_v53 }
  0x98   : > { %771 = vmatmul.mubr.f32.vlgmr.msra.gmra.mrb[0].mxu0 %v338_v48 }
  0x99   : > { %773 = vmatprep.mubr.msk.f32.mxu0 %vm1135_vm0, %v1136_v7 }
  0x9c   : > { %774 = vmatmul.mubr.f32.gmra.mrb[2].mxu0 %v339_v49 }
  0x9d   : > { %776 = vmatprep.mubr.msk.f32.mxu0 %vm1135_vm0, %v1136_v7 }
  0xa0   : > { %777 = vmatmul.mubr.f32.gmra.mrb[4].mxu0 %v340_v50 }
 0x16b   : > { %v430_v55 = vpop.f32.mrb[0].mxu0 }
 0x16c   : > { %v431_v56 = vadd.f32 %v693_v54, %v430_v55  ;;  %v772_v57 = vpop.f32.mrb[1].mxu0 }
 0x16e   : > { %v444_v58 = vmax.f32 %v431_v56, 0.0 }
 0x16f   : > { %v435_v59 = vpop.f32.mrb[2].mxu0 }
 0x170   : > { %v436_v60 = vadd.f32 %v693_v54, %v435_v59  ;;  %v775_v61 = vpop.f32.mrb[3].mxu0  ;;  %812 = vmatmul.mubr.f32.vlgmr.msra.gmra.mrb[0].mxu1 %v444_v58 }
 0x171   : > { %814 = vmatprep.mubr.msk.f32.mxu1 %vm1135_vm0, %v1136_v7 }
 0x172   : > { %v445_v62 = vmax.f32 %v436_v60, 0.0 }
 0x173   : > { %v440_v63 = vpop.f32.mrb[4].mxu0 }
 0x174   : > { %v441_v0 = vadd.f32 %v693_v54, %v440_v63  ;;  %v778_v1 = vpop.f32.mrb[5].mxu0  ;;  %815 = vmatmul.mubr.f32.gmra.mrb[2].mxu1 %v445_v62 }
 0x175   : > { %817 = vmatprep.mubr.msk.f32.mxu1 %vm1135_vm0, %v1136_v7 }
 0x176   : > { %v446_v2 = vmax.f32 %v441_v0, 0.0 }
 0x178   : > { %818 = vmatmul.mubr.f32.gmra.mrb[4].mxu1 %v446_v2 }
 0x243   : > { %v532_v4 = vpop.f32.mrb[0].mxu1 }
 0x244   : > { %v546_v5 = vadd.f32 %v532_v4, %v447_v3  ;;  %v813_v6 = vpop.f32.mrb[1].mxu1 }
 0x246   : > { %549 = vst [vmem:[#allocation2] sm:$0xff] %v546_v5 }
 0x247   : > { %v537_v9 = vpop.f32.mrb[2].mxu1 }
 0x248   : > { %v547_v10 = vadd.f32 %v537_v9, %v448_v8  ;;  %v816_v11 = vpop.f32.mrb[3].mxu1  ;;  %555 = sbr.rel (%p694_p1) target bundleno = 599 (0x257), region = 60 }
 0x24a   : > { %550 = vst [vmem:[#allocation2 + $0x8] sm:$0xff] %v547_v10 }
 0x24b   : > { %v542_v13 = vpop.f32.mrb[4].mxu1 }
 0x24c   : > { %v548_v14 = vadd.f32 %v542_v13, %v449_v12  ;;  %v819_v15 = vpop.f32.mrb[5].mxu1 }
 0x24d   : > { %v556_v7 = vld [vmem:[#allocation2] sm:$0xff] (!%p694_p1) }
 0x24e   : > { %551 = vst [vmem:[#allocation2 + $0x10] sm:$0xff] %v548_v14  ;;  %559 = vst [vmem:[#allocation9] sm:$0xff] (!%p694_p1), %v556_v7 }
 0x251   : > { %v557_v16 = vld [vmem:[#allocation2 + $0x8] sm:$0xff] }
 0x252   : > { %560 = vst [vmem:[#allocation9 + $0x8] sm:$0xff] %v557_v16 }
 0x255   : > { %v558_v17 = vld [vmem:[#allocation2 + $0x10] sm:$0xff] }
 0x256   : > { %561 = vst [vmem:[#allocation9 + $0x10] sm:$0xff] %v558_v17 }
 0x257 PF: > { %p894_p6 = scmp.eq.s32.totalorder %s1267_s16, 2  ;;  %s1137_s14 = smov [#allocation9]  }
 0x258   : > { %s571_s28 = sshll.u32 %s1137_s14, 4  ;;  %s572_s28 = int_to_ptr.vmem [resolvable:$true] %s571_s28 }
 0x259   : > { %s1042_s7 = scalar_lea.vmem %s572_s28, 384  ;;  %p1049_p12 = scmp.lt.s32.totalorder %s572_s28, %s572_s28 }
 0x25a   : > { %p1043_p4 = scmp.ne.s32.totalorder %s572_s28, %s1042_s7  ;;  %p1050_p10 = scmp.lt.s32.totalorder %s1042_s7, %s1042_s7 }
 0x25c   : > { %p1044_p7 = pnand %p1043_p4, %p894_p6  ;;  %p1051_p0 = por %p1050_p10, %p1049_p12 }
 0x25e   : > { %p1045_p9 = pneg %p1044_p7 }
 0x260   : > { %p1052_p8 = pnand %p1051_p0, %p1045_p9 }
 0x262   : > { %1055 = shalt.err (!%p1052_p8)
}
 0x263   : > { %s1056_s27 = scalar_lea.hbm %s1494_s5, 384 }
 0x264   : > { %p1057_p13 = scmp.ne.s32.totalorder %s1494_s5, %s1056_s27  ;;  %p1062_p5 = scmp.lt.u32.totalorder %s1056_s27, %s1494_s5 }
 0x266   : > { %p1058_p2 = pnand %p1057_p13, %p894_p6 }
 0x268   : > { %p1059_p3 = pneg %p1058_p2 }
 0x26a   : > { %p1064_p11 = pnand %p1062_p5, %p1059_p3 }
 0x26c   : > { %1067 = shalt.err (!%p1064_p11)
}
 0x26d   : > { %s1138_s15 = smov 128   ;;  %s1139_s25 = smov 8  }
 0x26e   : > { %877 = dma.vmem_to_hbm [thread:$0]  (%p894_p6), %s572_s28, 384, %s1494_s5, [#allocation5], %s1138_s15, %s1138_s15, %s1139_s25  }
 0x26f   : > { %1101 = dma.done.wait (%p894_p6), [#allocation5], 384  }
 0x270   : > { %1103 = vsyncadd (%p894_p6), [#allocation5], 4294966912 }
 0x271 PF: > { %s20_s23 = sadd.s32 1, %s1126_s23   ;;  %s1507_s18 = smov %s1110_s19 }
 0x272   : > { %p17_p1 = scmp.ge.s32.totalorder %s20_s23, 5   ;;  %s1508_s19 = smov %s1114_s20 }
 0x273   : > { %s1509_s20 = smov %s1217_s30  ;;  %s1510_s21 = smov %s1122_s22 }
 0x274   : > { %s1511_s22 = smov %s1513_s24  ;;  %19 = sbr.rel (!%p17_p1) target bundleno = 6 (0x6), region = 106 }
 0x27b   :  { %587 = vsyncpa [#allocation4], 1 }
 0x27c   :  { %589 = vsyncpa [#allocation4 + $0x1], 1 }
 0x27d   :  { %590 = vsyncpa [#allocation7], 1 }
 0x27e   :  { %592 = vsyncpa [#allocation7 + $0x1], 1 }
 0x27f   :  { %593 = vsyncpa [#allocation5], 1 }
 0x280   :  { %595 = vsyncpa [#allocation5 + $0x1], 1 }

</bundles_post_ra>
